<compile_context>
chip_gen: v5e
topology: v5e:2x2
jax: 0.10.0
libtpu: 0.0.40
codegen_flags: <defaults>
</compile_context>

<pallas_src>
import functools

import jax
import jax.numpy as jnp
from jax.experimental import pallas as pl
from jax.experimental.pallas import tpu as pltpu

_LANE = 128
_SUBLANE = 8


def _round_up(x, m):
    return ((x + m - 1) // m) * m


def _pad2d(x, rows, cols):
    r, c = x.shape
    return jnp.pad(x, ((0, rows - r), (0, cols - c)))


def _vmem_capacity_bytes():
    """Generation-aware VMEM capacity; conservative fallback if unavailable."""
    try:
        info = pltpu.get_tpu_info()
        cap = getattr(info, "vmem_capacity_bytes", None)
        if cap:
            return int(cap)
    except Exception:
        pass
    return 64 << 20  # v7x per-TC physical VMEM (smallest across generations)


def _mlp_kernel(z_ref, w1_ref, b1_ref, w2_ref, b2_ref, feat_ref):
    # layer 1: Linear(latent -> latent) + ReLU  (MXU, f32 accumulate)
    z = z_ref[...]
    h1 = jnp.dot(z, w1_ref[...], preferred_element_type=jnp.float32)
    h1 = jnp.maximum(h1 + b1_ref[...], 0.0)

    # layer 2: Linear(latent -> e_dim) + ReLU
    h2 = jnp.dot(h1, w2_ref[...], preferred_element_type=jnp.float32)
    h2 = jnp.maximum(h2 + b2_ref[...], 0.0)

    feat_ref[...] = h2.astype(feat_ref.dtype)


def prepare_params(params):
    """Pad weights/biases once (outside the per-call jit). Zero lane padding
    is exact through ReLU, so sliced results match the unpadded math."""
    latent_dim = params["w1"].shape[0]
    e_dim = params["w2"].shape[1]
    latent_p = _round_up(latent_dim, _LANE)
    e_p = _round_up(e_dim, _LANE)
    return {
        "w1": _pad2d(params["w1"], latent_dim, latent_p),   # keep contraction dim unpadded
        "b1": _pad2d(params["b1"], 1, latent_p),
        "w2": _pad2d(params["w2"], latent_p, e_p),
        "b2": _pad2d(params["b2"], 1, e_p),
        "w3": params["w3"],                                  # logits layer stays in XLA
        "b3": params["b3"],
    }


@functools.partial(jax.jit, static_argnames=("tile_b",))
def memb_inf_attk_forward(z, padded_params, *, tile_b=1024):
    """MembInfAttk forward pass.

    Args:
      z: [B, latent_dim] float32.
      padded_params: output of prepare_params().
      tile_b: batch tile size (rows per grid step).
    Returns:
      (feat_out [B, 2], feat [B, e_dim]) float32.
    """
    B, latent_dim = z.shape
    w1 = padded_params["w1"]
    b1 = padded_params["b1"]
    w2 = padded_params["w2"]
    b2 = padded_params["b2"]
    w3 = padded_params["w3"]
    b3 = padded_params["b3"]

    latent_p = w1.shape[1]
    e_p = w2.shape[1]
    e_dim = w3.shape[0]

    # Batch tiling: sublane-aligned, no bigger than the padded batch.
    tile_b = max(_SUBLANE, min(tile_b, _round_up(B, _SUBLANE)))
    # v7x megacore: keep >= 2 grid steps when the batch is large enough so the
    # "parallel" axis can actually be sharded across both TensorCores.
    if B >= 1024:
        tile_b = min(tile_b, _round_up(-(-B // 2), _SUBLANE))
    b_p = _round_up(B, tile_b)
    grid = (b_p // tile_b,)

    # Batch padding only; z keeps its true (unpadded) lane width.
    z_p = jnp.pad(z, ((0, b_p - B), (0, 0)))

    # Activation tiles march over the batch; weights are grid-invariant
    # (constant index_map -> VMEM-resident, fetched once).
    z_spec = pl.BlockSpec((tile_b, latent_dim), lambda i: (i, 0))
    w_specs = [
        pl.BlockSpec((latent_dim, latent_p), lambda i: (0, 0)),
        pl.BlockSpec((1, latent_p), lambda i: (0, 0)),
        pl.BlockSpec((latent_p, e_p), lambda i: (0, 0)),
        pl.BlockSpec((1, e_p), lambda i: (0, 0)),
    ]
    feat_spec = pl.BlockSpec((tile_b, e_p), lambda i: (i, 0))

    # VMEM budget: resident weights (x2 safety) + double-buffered streaming
    # tiles + live intermediates, checked against the real per-generation cap.
    vmem_cap = (_vmem_capacity_bytes() * 7) // 8
    bytes_weights = 4 * (latent_dim * latent_p + latent_p + latent_p * e_p + e_p)
    bytes_io = 4 * tile_b * (latent_dim + e_p)      # streamed in/out per tile
    bytes_live = 4 * tile_b * (latent_p + e_p)      # h1 / h2 intermediates
    needed = 2 * bytes_weights + 2 * bytes_io + bytes_live
    assert needed <= vmem_cap, (
        f"tile_b={tile_b} needs ~{needed >> 20} MiB VMEM, "
        f"cap is {vmem_cap >> 20} MiB — reduce tile_b")
    vmem_bytes = int(min(max(needed + (4 << 20), 16 << 20), vmem_cap))

    # Advisory cost estimate from TRUE (unpadded) dims.
    flops = 2 * B * (latent_dim * latent_dim + latent_dim * e_dim)
    bytes_accessed = 4 * (B * latent_dim + B * e_dim
                          + latent_dim * latent_dim + latent_dim * e_dim
                          + latent_dim + e_dim)

    feat_p = pl.pallas_call(
        _mlp_kernel,
        out_shape=jax.ShapeDtypeStruct((b_p, e_p), jnp.float32),
        grid=grid,
        in_specs=[z_spec] + w_specs,
        out_specs=feat_spec,
        compiler_params=pltpu.CompilerParams(
            dimension_semantics=("parallel",),
            vmem_limit_bytes=vmem_bytes),
        cost_estimate=pl.CostEstimate(
            flops=flops, transcendentals=0, bytes_accessed=bytes_accessed),
    )(z_p, w1, b1, w2, b2)

    # Slice off batch / lane padding; the tiny e_dim->2 logits layer fuses
    # with this slice in XLA (cheaper than writing a 128-lane logits slab).
    feat = feat_p[:B, :e_dim]
    feat_out = feat @ w3 + b3
    return feat_out, feat


def init_params(key, latent_dim, e_dim):
    """Deterministic synthetic parameter init (nn.Linear shapes, stored
    transposed as [in, out])."""
    ks = jax.random.split(key, 6)
    s1 = 1.0 / jnp.sqrt(latent_dim)
    s2 = 1.0 / jnp.sqrt(latent_dim)
    s3 = 1.0 / jnp.sqrt(e_dim)
    return {
        "w1": jax.random.uniform(ks[0], (latent_dim, latent_dim), jnp.float32, -s1, s1),
        "b1": jax.random.uniform(ks[1], (1, latent_dim), jnp.float32, -s1, s1),
        "w2": jax.random.uniform(ks[2], (latent_dim, e_dim), jnp.float32, -s2, s2),
        "b2": jax.random.uniform(ks[3], (1, e_dim), jnp.float32, -s2, s2),
        "w3": jax.random.uniform(ks[4], (e_dim, 2), jnp.float32, -s3, s3),
        "b3": jax.random.uniform(ks[5], (1, 2), jnp.float32, -s3, s3),
    }


def _reference(z, p):
    h1 = jnp.maximum(z @ p["w1"] + p["b1"], 0.0)
    h2 = jnp.maximum(h1 @ p["w2"] + p["b2"], 0.0)
    return h2 @ p["w3"] + p["b3"], h2


if __name__ == "__main__":
    key = jax.random.PRNGKey(0)
    k_z, k_p = jax.random.split(key)

    batch = 8
    latent_dim = 32   # args.latent_dim
    e_dim = 32        # args.e_dim

    z = jax.random.normal(k_z, (batch, latent_dim), dtype=jnp.float32)
    params = init_params(k_p, latent_dim, e_dim)
    padded_params = prepare_params(params)   # hoisted out of the forward call

    feat_out, feat = memb_inf_attk_forward(z, padded_params)
    jax.block_until_ready((feat_out, feat))

    ref_out, ref_feat = _reference(z, params)
    assert feat_out.shape == (batch, 2), feat_out.shape
    assert feat.shape == (batch, e_dim), feat.shape
    assert jnp.allclose(feat_out, ref_out, atol=1e-5, rtol=1e-5)
    assert jnp.allclose(feat, ref_feat, atol=1e-5, rtol=1e-5)

    print("KERNEL_OK")
</pallas_src>

<mosaic_0001>
module attributes {stable_mosaic.version = 11 : i64} {
  func.func @_mlp_kernel(%arg0: i32, %arg1: memref<8x32xf32, #tpu.memory_space<vmem>>, %arg2: memref<32x128xf32, #tpu.memory_space<vmem>>, %arg3: memref<1x128xf32, #tpu.memory_space<vmem>>, %arg4: memref<128x128xf32, #tpu.memory_space<vmem>>, %arg5: memref<1x128xf32, #tpu.memory_space<vmem>>, %arg6: memref<8x128xf32, #tpu.memory_space<vmem>>) attributes {dimension_semantics = [#tpu.dimension_semantics<parallel>], iteration_bounds = array<i64: 1>, scalar_prefetch = 0 : i64, scratch_operands = 0 : i64, tpu.core_type = #tpu.core_type<tc>, window_params = [{transform_indices = @transform_0, window_bounds = array<i64: 8, 32>}, {pipeline_mode = #tpu.pipeline_mode<synchronous>, transform_indices = @transform_1, window_bounds = array<i64: 32, 128>}, {pipeline_mode = #tpu.pipeline_mode<synchronous>, transform_indices = @transform_2, window_bounds = array<i64: 1, 128>}, {pipeline_mode = #tpu.pipeline_mode<synchronous>, transform_indices = @transform_3, window_bounds = array<i64: 128, 128>}, {pipeline_mode = #tpu.pipeline_mode<synchronous>, transform_indices = @transform_4, window_bounds = array<i64: 1, 128>}, {transform_indices = @transform_5, window_bounds = array<i64: 8, 128>}]} {
    %c0 = arith.constant 0 : index
    %c0_0 = arith.constant 0 : index
    %0 = vector.load %arg1[%c0, %c0_0] : memref<8x32xf32, #tpu.memory_space<vmem>>, vector<8x32xf32>
    %c0_1 = arith.constant 0 : index
    %c0_2 = arith.constant 0 : index
    %1 = vector.load %arg2[%c0_1, %c0_2] : memref<32x128xf32, #tpu.memory_space<vmem>>, vector<32x128xf32>
    %cst = arith.constant dense<0.000000e+00> : vector<8x128xf32>
    %2 = tpu.matmul %0, %1, %cst {dimension_numbers = #tpu.dot_dimension_numbers<[1], [0], [0], [1], [0, 0, 1, 1], [], []>} : vector<8x32xf32>, vector<32x128xf32>, vector<8x128xf32> -> vector<8x128xf32>
    %c0_3 = arith.constant 0 : index
    %c0_4 = arith.constant 0 : index
    %3 = vector.load %arg3[%c0_3, %c0_4] : memref<1x128xf32, #tpu.memory_space<vmem>>, vector<1x128xf32>
    %4 = vector.broadcast %3 : vector<1x128xf32> to vector<8x128xf32>
    %5 = arith.addf %2, %4 : vector<8x128xf32>
    %cst_5 = arith.constant 0.000000e+00 : f32
    %6 = vector.broadcast %cst_5 : f32 to vector<8x128xf32>
    %7 = arith.maximumf %5, %6 : vector<8x128xf32>
    %c0_6 = arith.constant 0 : index
    %c0_7 = arith.constant 0 : index
    %8 = vector.load %arg4[%c0_6, %c0_7] : memref<128x128xf32, #tpu.memory_space<vmem>>, vector<128x128xf32>
    %cst_8 = arith.constant dense<0.000000e+00> : vector<8x128xf32>
    %9 = tpu.matmul %7, %8, %cst_8 {dimension_numbers = #tpu.dot_dimension_numbers<[1], [0], [0], [1], [0, 0, 1, 1], [], []>} : vector<8x128xf32>, vector<128x128xf32>, vector<8x128xf32> -> vector<8x128xf32>
    %c0_9 = arith.constant 0 : index
    %c0_10 = arith.constant 0 : index
    %10 = vector.load %arg5[%c0_9, %c0_10] : memref<1x128xf32, #tpu.memory_space<vmem>>, vector<1x128xf32>
    %11 = vector.broadcast %10 : vector<1x128xf32> to vector<8x128xf32>
    %12 = arith.addf %9, %11 : vector<8x128xf32>
    %cst_11 = arith.constant 0.000000e+00 : f32
    %13 = vector.broadcast %cst_11 : f32 to vector<8x128xf32>
    %14 = arith.maximumf %12, %13 : vector<8x128xf32>
    %c0_12 = arith.constant 0 : index
    %c0_13 = arith.constant 0 : index
    %15 = vector.load %arg6[%c0_12, %c0_13] : memref<8x128xf32, #tpu.memory_space<vmem>>, vector<8x128xf32>
    tpu.vector_store %arg6[%c0_12, %c0_13], %14 {strides = array<i32>} : memref<8x128xf32, #tpu.memory_space<vmem>>, vector<8x128xf32>,
    return
  }
  func.func @transform_0(%arg0: i32) -> (i32, i32) {
    %c0_i32 = arith.constant 0 : i32
    %c0_i32_0 = arith.constant 0 : i32
    return %arg0, %c0_i32 : i32, i32
  }
  func.func @transform_1(%arg0: i32) -> (i32, i32) {
    %c0_i32 = arith.constant 0 : i32
    %c0_i32_0 = arith.constant 0 : i32
    %c0_i32_1 = arith.constant 0 : i32
    return %c0_i32, %c0_i32_0 : i32, i32
  }
  func.func @transform_2(%arg0: i32) -> (i32, i32) {
    %c0_i32 = arith.constant 0 : i32
    %c0_i32_0 = arith.constant 0 : i32
    %c0_i32_1 = arith.constant 0 : i32
    return %c0_i32, %c0_i32_0 : i32, i32
  }
  func.func @transform_3(%arg0: i32) -> (i32, i32) {
    %c0_i32 = arith.constant 0 : i32
    %c0_i32_0 = arith.constant 0 : i32
    %c0_i32_1 = arith.constant 0 : i32
    return %c0_i32, %c0_i32_0 : i32, i32
  }
  func.func @transform_4(%arg0: i32) -> (i32, i32) {
    %c0_i32 = arith.constant 0 : i32
    %c0_i32_0 = arith.constant 0 : i32
    %c0_i32_1 = arith.constant 0 : i32
    return %c0_i32, %c0_i32_0 : i32, i32
  }
  func.func @transform_5(%arg0: i32) -> (i32, i32) {
    %c0_i32 = arith.constant 0 : i32
    %c0_i32_0 = arith.constant 0 : i32
    return %arg0, %c0_i32 : i32, i32
  }
}

</mosaic_0001>

<bundles_post_ra>
// kernel: memb_inf_attk_forward.1
= control target key start
LH: loop header
LB: loop body
LE: loop exit
PB: predicated region body
PF: predicated region fallthrough
CT: control target
= control target key end

     0   :  { %10 = vsyncpa [#allocation3], 0  ;;  %s284_s0 = inlined_call_operand.hbm [shape: f32[8,32], index: 0, kind: input, shape index: {}]   ;;  %s285_s1 = inlined_call_operand.hbm [shape: f32[32,128], index: 1, kind: input, shape index: {}]   ;;  %s286_s2 = inlined_call_operand.vmem [shape: f32[1,128], index: 2, kind: input, shape index: {}]   ;;  %s287_s3 = inlined_call_operand.hbm [shape: f32[128,128], index: 3, kind: input, shape index: {}]   ;;  %s288_s4 = inlined_call_operand.vmem [shape: f32[1,128], index: 4, kind: input, shape index: {}]   ;;  %s289_s5 = inlined_call_operand.vmem [shape: f32[8,128], index: 5, kind: output, shape index: {}]  }
   0x1   :  { %11 = vsyncpa [#allocation5], 0  ;;  %s27_s20 = sshll.u32 %s285_s1, 4  ;;  %s231_s21 = smov [#allocation4]   ;;  %s28_s20 = int_to_ptr.hbm [resolvable:$true] %s27_s20 }
   0x2   :  { %s29_s22 = sshll.u32 %s231_s21, 4  ;;  %s17_s25 = sshll.u32 %s284_s0, 4  ;;  %s30_s22 = int_to_ptr.vmem [resolvable:$true] %s29_s22  ;;  %s18_s25 = int_to_ptr.hbm [resolvable:$true] %s17_s25 }
   0x3   :  { %s232_s26 = smov 128   ;;  %s233_s27 = smov 8  }
   0x4   :  { %35 = dma.hbm_to_vmem [thread:$0]  %s28_s20, 512, %s30_s22, [#allocation5], %s232_s26, %s232_s26, %s233_s27  }
   0x5   :  { %s234_s28 = smov [#allocation2]   ;;  %s42_s7 = sshll.u32 %s287_s3, 4  ;;  %s43_s7 = int_to_ptr.hbm [resolvable:$true] %s42_s7 }
   0x6   :  { %s19_s29 = sshll.u32 %s234_s28, 4  ;;  %s235_s1 = smov [#allocation6]   ;;  %s20_s29 = int_to_ptr.vmem [resolvable:$true] %s19_s29 }
   0x7   :  { %22 = dma.hbm_to_vmem [thread:$0]  %s18_s25, 128, %s20_s29, [#allocation3]  }
   0x8   :  { %s44_s8 = sshll.u32 %s235_s1, 4  ;;  %s45_s8 = int_to_ptr.vmem [resolvable:$true] %s44_s8 }
   0x9   :  { %50 = dma.hbm_to_vmem [thread:$0]  %s43_s7, 2048, %s45_s8, [#allocation5], %s232_s26, %s232_s26, %s233_s27  }
   0xa   :  { %227 = dma.done.wait [#allocation3], 128  }
   0xb   :  { %228 = vsyncadd [#allocation3], 4294967168 }
   0xc   :  { %229 = dma.done.wait [#allocation5], 2560  }
   0xd   :  { %230 = vsyncadd [#allocation5], 4294964736  ;;  %v69_v0 = vld [vmem:[#allocation4 + $0x18] sm:$0xff]  ;;  %v68_v1 = vld [vmem:[#allocation4 + $0x10] sm:$0xff]  ;;  %vm74_vm0 = vcmask 261120  }
   0xe   :  { %90 = vmatpush.msra.mxu0 %v69_v0  ;;  %v114_v2 = vld [vmem:[#allocation6 + $0x78] sm:$0xff]  ;;  %v67_v3 = vld [vmem:[#allocation4 + $0x8] sm:$0xff]  ;;  %v113_v4 = vld [vmem:[#allocation6 + $0x70] sm:$0xff] }
   0xf   :  { %119 = vmatpush.msra.mxu1 %v114_v2  ;;  %v112_v5 = vld [vmem:[#allocation6 + $0x68] sm:$0xff]  ;;  %v66_v6 = vld [vmem:[#allocation4] sm:$0xff]  ;;  %v65_v7 = vld [vmem:[#allocation2] sm:$0xff] }
  0x10   :  { %91 = vmatpush.msra.mxu0 %v68_v1  ;;  %v111_v8 = vld [vmem:[#allocation6 + $0x60] sm:$0xff]  ;;  %v110_v9 = vld [vmem:[#allocation6 + $0x58] sm:$0xff]  ;;  %v109_v10 = vld [vmem:[#allocation6 + $0x50] sm:$0xff] }
  0x11   :  { %120 = vmatpush.msra.mxu1 %v113_v4  ;;  %v108_v11 = vld [vmem:[#allocation6 + $0x48] sm:$0xff]  ;;  %v107_v12 = vld [vmem:[#allocation6 + $0x40] sm:$0xff]  ;;  %v106_v13 = vld [vmem:[#allocation6 + $0x38] sm:$0xff] }
  0x12   :  { %92 = vmatpush.msra.mxu0 %v67_v3  ;;  %v105_v14 = vld [vmem:[#allocation6 + $0x30] sm:$0xff]  ;;  %v104_v15 = vld [vmem:[#allocation6 + $0x28] sm:$0xff]  ;;  %v103_v16 = vld [vmem:[#allocation6 + $0x20] sm:$0xff] }
  0x13   :  { %121 = vmatpush.msra.mxu1 %v112_v5  ;;  %v102_v17 = vld [vmem:[#allocation6 + $0x18] sm:$0xff]  ;;  %v101_v18 = vld [vmem:[#allocation6 + $0x10] sm:$0xff]  ;;  %v100_v19 = vld [vmem:[#allocation6 + $0x8] sm:$0xff] }
  0x14   :  { %93 = vmatpush.msra.mxu0 %v66_v6  ;;  %v99_v20 = vld [vmem:[#allocation6] sm:$0xff]  ;;  %v153_v21 = vld [vmem:[%s286_s2] ss:$0 sm:$0xff] }
  0x15   :  { %147 = vmatmul.msk.f32.vlgmr.msra.gmra.mxu0 %vm74_vm0, %v65_v7  ;;  %122 = vmatpush.msra.mxu1 %v111_v8  ;;  %v154_v25 = vld [vmem:[%s288_s4] ss:$0 sm:$0xff] }
  0x17   :  { %123 = vmatpush.msra.mxu1 %v110_v9 }
  0x19   :  { %124 = vmatpush.msra.mxu1 %v109_v10 }
  0x1b   :  { %125 = vmatpush.msra.mxu1 %v108_v11 }
  0x1d   :  { %126 = vmatpush.msra.mxu1 %v107_v12 }
  0x1f   :  { %127 = vmatpush.msra.mxu1 %v106_v13 }
  0x21   :  { %128 = vmatpush.msra.mxu1 %v105_v14 }
  0x23   :  { %129 = vmatpush.msra.mxu1 %v104_v15 }
  0x25   :  { %130 = vmatpush.msra.mxu1 %v103_v16 }
  0x27   :  { %131 = vmatpush.msra.mxu1 %v102_v17 }
  0x29   :  { %132 = vmatpush.msra.mxu1 %v101_v18 }
  0x2b   :  { %133 = vmatpush.msra.mxu1 %v100_v19 }
  0x2d   :  { %134 = vmatpush.msra.mxu1 %v99_v20 }
  0x92   :  { %v95_v22 = vpop.f32.mrf.mxu0 }
  0x93   :  { %v96_v23 = vadd.f32 %v153_v21, %v95_v22 }
  0x95   :  { %v98_v24 = vmax.f32 %v96_v23, 0.0 }
  0x97   :  { %135 = vmatmul.f32.vlgmr.msra.gmra.mxu1 %v98_v24 }
 0x114   :  { %v136_v26 = vpop.f32.mrf.mxu1 }
 0x115   :  { %v137_v27 = vadd.f32 %v154_v25, %v136_v26 }
 0x117   :  { %v139_v28 = vmax.f32 %v137_v27, 0.0 }
 0x119   :  { %140 = vst [vmem:[%s289_s5] sm:$0xff] %v139_v28 }
 0x11a   :  { %145 = vsyncpa [#allocation3], 1 }
 0x11b   :  { %146 = vsyncpa [#allocation5], 1 }

</bundles_post_ra>
